<compile_context>
chip_gen: v6e
topology: v6e:2x2x1
jax: 0.10.0
libtpu: 0.0.40
codegen_flags: <defaults>
</compile_context>

<pallas_src>
import jax
import jax.numpy as jnp
from jax.experimental import pallas as pl
from jax.experimental.pallas import tpu as pltpu


# ----------------------------------------------------------------------------
# Kernel factory. Block shapes:
#   x_ref:    (B, C, HW)   NCHW flattened over space, native dtype
#   mask_ref: (B, 1, HW)   board mask (1 on-board, 0 off-board)
#   out_ref:  (B, 3, C)    rows: [mean, mean*(sqrt(msum)-14)/10, masked max], f32
# ----------------------------------------------------------------------------
def _make_gpool_kernel(use_mxu_sum: bool):
    def kernel(x_ref, mask_ref, out_ref):
        xr = x_ref[...]                               # native dtype (f32 / bf16)
        m = mask_ref[...].astype(jnp.float32)         # (B, 1, HW)
        B, C, HW = xr.shape
        x = xr.astype(jnp.float32)                    # (B, C, HW)

        # mask_sum_hw recomputed in-kernel (drops one DMA + VMEM buffer); clamp so
        # garbage rows of a ragged (cdiv) tail block can never divide by zero.
        msum = jnp.maximum(jnp.sum(m, axis=-1), 1.0)            # (B, 1)
        inv = 1.0 / msum                                        # one divide per row
        scale = (jnp.sqrt(msum) - 14.0) * 0.1                   # (B, 1)

        if use_mxu_sum:
            # Spatial sum on the (otherwise idle) MXU: ones-column matvec with f32
            # accumulation; leaves the 2 XLUs free for the masked-max reduce.
            ones_col = jnp.ones((HW, 1), xr.dtype)
            prec = jax.lax.Precision.HIGHEST if xr.dtype == jnp.float32 else None
            row_sum = jnp.dot(
                xr.reshape(B * C, HW), ones_col,
                preferred_element_type=jnp.float32,
                precision=prec,
            ).reshape(B, C)                                     # (B, C)
        else:
            row_sum = jnp.sum(x, axis=-1)                       # (B, C) XLU reduce

        layer_mean = row_sum * inv                              # (B, C)

        # Masked max, exactly as the torch module: max over HW of (x + (mask - 1)).
        # Relies on x being pre-masked (off-board activations already zero), same
        # implicit contract as KataGPool.
        layer_max = jnp.max(x + (m - 1.0), axis=-1)             # (B, C)

        # Three sublane-row stores: no lane-axis concatenate / odd-offset partials.
        out_ref[:, 0, :] = layer_mean
        out_ref[:, 1, :] = layer_mean * scale
        out_ref[:, 2, :] = layer_max

    return kernel


def _vmem_capacity_bytes():
    try:
        return int(getattr(pltpu.get_tpu_info(), "vmem_capacity_bytes", 64 << 20))
    except Exception:
        return 64 << 20   # v7x per-TensorCore VMEM: smallest of current generations


# ----------------------------------------------------------------------------
# Wrapper: PyTorch-facing layout (x NCHW, mask N1HW, mask_sum_hw N111) -> N(3C)11.
# ----------------------------------------------------------------------------
def kata_gpool_forward(x, mask, mask_sum_hw=None, *, batch_block=None, mxu_sum=None):
    """KataGPool forward.

    mask_sum_hw is accepted for interface parity with the torch module but is
    recomputed in-kernel from `mask` (they are equal by KataGo's contract).
    x is assumed pre-masked (off-board cells already zero), as upstream layers ensure.
    mxu_sum: None = auto (MXU spatial-sum offload for sub-f32 inputs whose channel
    count collapses cleanly into sublane tiles); True/False forces the path.
    """
    del mask_sum_hw  # recomputed inside the kernel (== sum(mask) by contract)

    N, C, H, W = x.shape
    HW = H * W
    itemsize = jnp.dtype(x.dtype).itemsize

    xf = x.reshape(N, C, HW)        # free reshape (no transpose): NCHW stays contiguous
    mf = mask.reshape(N, 1, HW)

    # ---- batch-block / VMEM sizing (generation-aware via get_tpu_info) ----
    vmem_cap = _vmem_capacity_bytes()
    # Pipelined working set per batch row:
    #   x:    2x double-buffered input + ~2 f32 temporaries (x_f32, x + (m-1))
    #   mask: 2x double-buffered (sublane-padded 1->8) + 1 f32 copy
    per_row = C * HW * (2 * itemsize + 2 * 4) + 8 * HW * (2 * itemsize + 4)

    if batch_block is None:
        ws_budget = max(per_row, (vmem_cap * 2) // 5)   # ~40% of VMEM for working set
        B = max(1, min(N, ws_budget // per_row, 256))
        # Keep >= 2 grid steps so dimension_semantics=("parallel",) can shard across
        # both TensorCores on v7x (harmless on single-TC v5e/v6e).
        if N >= 2:
            B = min(B, (N + 1) // 2)
    else:
        B = max(1, min(int(batch_block), N))

    est_bytes = per_row * B + 2 * (3 * C * 4) * B + (1 << 20)
    vmem_limit = int(min(vmem_cap, max(2 * est_bytes, 32 << 20)))

    # ---- spatial-sum path selection ----
    if mxu_sum is None:
        sublane_rows = 8 * max(1, 4 // itemsize)        # f32: 8, bf16: 16, fp8: 32
        use_mxu_sum = (itemsize < 4) and (C % sublane_rows == 0)
    else:
        use_mxu_sum = bool(mxu_sum)

    out = pl.pallas_call(
        _make_gpool_kernel(use_mxu_sum),
        out_shape=jax.ShapeDtypeStruct((N, 3, C), jnp.float32),
        grid=(pl.cdiv(N, B),),
        in_specs=[
            pl.BlockSpec((B, C, HW), lambda i: (i, 0, 0)),
            pl.BlockSpec((B, 1, HW), lambda i: (i, 0, 0)),
        ],
        out_specs=pl.BlockSpec((B, 3, C), lambda i: (i, 0, 0)),
        compiler_params=pltpu.CompilerParams(
            dimension_semantics=("parallel",),
            vmem_limit_bytes=vmem_limit,
        ),
    )(xf, mf)

    # (N, 3, C) -> (N, 3C, 1, 1) is a free reshape; channel order matches
    # torch.cat((mean, mean * scaled, max), dim=1).
    return out.reshape(N, 3 * C, 1, 1)


# ----------------------------------------------------------------------------
# Pure-JAX reference mirroring the torch forward exactly.
# ----------------------------------------------------------------------------
def reference_forward(x, mask, mask_sum_hw):
    x = x.astype(jnp.float32)
    mask = mask.astype(jnp.float32)
    mask_sum_hw = mask_sum_hw.astype(jnp.float32)
    N, C, H, W = x.shape
    sq_off = jnp.sqrt(mask_sum_hw) - 14.0
    layer_mean = jnp.sum(x, axis=(2, 3), keepdims=True) / mask_sum_hw
    layer_max = jnp.max((x + (mask - 1.0)).reshape(N, C, -1), axis=2)
    layer_max = layer_max.reshape(N, C, 1, 1)
    return jnp.concatenate(
        [layer_mean, layer_mean * (sq_off / 10.0), layer_max], axis=1)


if __name__ == "__main__":
    key = jax.random.PRNGKey(0)

    # f32 check with a ragged batch (N=5): exercises the cdiv grid (partial tail
    # block) and the >=2-grid-step megacore cap.
    N, C, H, W = 5, 32, 16, 16
    kx, _ = jax.random.split(key)
    x = jax.random.normal(kx, (N, C, H, W), dtype=jnp.float32)

    mask = jnp.ones((N, 1, H, W), jnp.float32)
    mask = mask.at[1, :, H - 1, :].set(0.0)          # ragged board, batch 1
    mask = mask.at[4, :, H - 2:, :].set(0.0)         # ragged board, batch 4
    x = x * mask                                      # KataGo contract: off-board = 0
    mask_sum_hw = jnp.sum(mask, axis=(2, 3), keepdims=True)   # (N, 1, 1, 1)

    out = jax.block_until_ready(kata_gpool_forward(x, mask, mask_sum_hw))
    ref = reference_forward(x, mask, mask_sum_hw)
    assert out.shape == ref.shape == (N, 3 * C, 1, 1), (out.shape, ref.shape)
    assert jnp.allclose(out, ref, atol=1e-4, rtol=1e-4), \
        float(jnp.max(jnp.abs(out - ref)))

    # bf16 check: native bf16 inputs (half the HBM traffic) + MXU spatial-sum path.
    xb = x.astype(jnp.bfloat16)
    mb = mask.astype(jnp.bfloat16)
    out_b = jax.block_until_ready(kata_gpool_forward(xb, mb, mask_sum_hw))
    ref_b = reference_forward(xb, mb, mask_sum_hw)
    assert jnp.allclose(out_b, ref_b, atol=2e-3, rtol=2e-3), \
        float(jnp.max(jnp.abs(out_b - ref_b)))

    print("KERNEL_OK")
</pallas_src>

<mosaic_0001>
module attributes {stable_mosaic.version = 11 : i64} {
  func.func @kernel(%arg0: i32, %arg1: memref<3x32x256xf32, #tpu.memory_space<vmem>>, %arg2: memref<3x1x256xf32, #tpu.memory_space<vmem>>, %arg3: memref<3x3x32xf32, #tpu.memory_space<vmem>>) attributes {dimension_semantics = [#tpu.dimension_semantics<parallel>], iteration_bounds = array<i64: 2>, scalar_prefetch = 0 : i64, scratch_operands = 0 : i64, tpu.core_type = #tpu.core_type<tc>, window_params = [{transform_indices = @transform_0, window_bounds = array<i64: 3, 32, 256>}, {transform_indices = @transform_1, window_bounds = array<i64: 3, 1, 256>}, {transform_indices = @transform_2, window_bounds = array<i64: 3, 3, 32>}]} {
    %c0 = arith.constant 0 : index
    %c0_0 = arith.constant 0 : index
    %c0_1 = arith.constant 0 : index
    %0 = vector.load %arg1[%c0, %c0_0, %c0_1] : memref<3x32x256xf32, #tpu.memory_space<vmem>>, vector<3x32x256xf32>
    %c0_2 = arith.constant 0 : index
    %c0_3 = arith.constant 0 : index
    %c0_4 = arith.constant 0 : index
    %1 = vector.load %arg2[%c0_2, %c0_3, %c0_4] : memref<3x1x256xf32, #tpu.memory_space<vmem>>, vector<3x1x256xf32>
    %cst = arith.constant dense<0.000000e+00> : vector<3x1xf32>
    %2 = vector.multi_reduction <add>, %1, %cst [2] : vector<3x1x256xf32> to vector<3x1xf32>
    %cst_5 = arith.constant 1.000000e+00 : f32
    %3 = vector.broadcast %cst_5 : f32 to vector<3x1xf32>
    %4 = arith.maximumf %2, %3 : vector<3x1xf32>
    %cst_6 = arith.constant 1.000000e+00 : f32
    %5 = vector.broadcast %cst_6 : f32 to vector<3x1xf32>
    %6 = arith.divf %5, %4 : vector<3x1xf32>
    %7 = math.sqrt %4 : vector<3x1xf32>
    %cst_7 = arith.constant 1.400000e+01 : f32
    %8 = vector.broadcast %cst_7 : f32 to vector<3x1xf32>
    %9 = arith.subf %7, %8 : vector<3x1xf32>
    %cst_8 = arith.constant 1.000000e-01 : f32
    %10 = vector.broadcast %cst_8 : f32 to vector<3x1xf32>
    %11 = arith.mulf %9, %10 : vector<3x1xf32>
    %cst_9 = arith.constant dense<0.000000e+00> : vector<3x32xf32>
    %12 = vector.multi_reduction <add>, %0, %cst_9 [2] : vector<3x32x256xf32> to vector<3x32xf32>
    %13 = vector.broadcast %6 : vector<3x1xf32> to vector<3x32xf32>
    %14 = arith.mulf %12, %13 : vector<3x32xf32>
    %cst_10 = arith.constant 1.000000e+00 : f32
    %15 = vector.broadcast %cst_10 : f32 to vector<3x1x256xf32>
    %16 = arith.subf %1, %15 : vector<3x1x256xf32>
    %17 = vector.broadcast %16 : vector<3x1x256xf32> to vector<3x32x256xf32>
    %18 = arith.addf %0, %17 : vector<3x32x256xf32>
    %cst_11 = arith.constant dense<0xFF800000> : vector<3x32xf32>
    %19 = vector.multi_reduction <maximumf>, %18, %cst_11 [2] : vector<3x32x256xf32> to vector<3x32xf32>
    %c0_12 = arith.constant 0 : index
    %c0_13 = arith.constant 0 : index
    %c0_14 = arith.constant 0 : index
    %20 = vector.load %arg3[%c0_12, %c0_13, %c0_14] : memref<3x3x32xf32, #tpu.memory_space<vmem>>, vector<3x1x32xf32>
    %21 = vector.shape_cast %20 : vector<3x1x32xf32> to vector<3x32xf32>
    %22 = vector.shape_cast %14 : vector<3x32xf32> to vector<3x1x32xf32>
    tpu.vector_store %arg3[%c0_12, %c0_13, %c0_14], %22 {strides = array<i32>} : memref<3x3x32xf32, #tpu.memory_space<vmem>>, vector<3x1x32xf32>,
    %23 = vector.broadcast %11 : vector<3x1xf32> to vector<3x32xf32>
    %24 = arith.mulf %14, %23 : vector<3x32xf32>
    %c0_15 = arith.constant 0 : index
    %c1 = arith.constant 1 : index
    %c0_16 = arith.constant 0 : index
    %25 = vector.load %arg3[%c0_15, %c1, %c0_16] : memref<3x3x32xf32, #tpu.memory_space<vmem>>, vector<3x1x32xf32>
    %26 = vector.shape_cast %25 : vector<3x1x32xf32> to vector<3x32xf32>
    %27 = vector.shape_cast %24 : vector<3x32xf32> to vector<3x1x32xf32>
    tpu.vector_store %arg3[%c0_15, %c1, %c0_16], %27 {strides = array<i32>} : memref<3x3x32xf32, #tpu.memory_space<vmem>>, vector<3x1x32xf32>,
    %c0_17 = arith.constant 0 : index
    %c2 = arith.constant 2 : index
    %c0_18 = arith.constant 0 : index
    %28 = vector.load %arg3[%c0_17, %c2, %c0_18] : memref<3x3x32xf32, #tpu.memory_space<vmem>>, vector<3x1x32xf32>
    %29 = vector.shape_cast %28 : vector<3x1x32xf32> to vector<3x32xf32>
    %30 = vector.shape_cast %19 : vector<3x32xf32> to vector<3x1x32xf32>
    tpu.vector_store %arg3[%c0_17, %c2, %c0_18], %30 {strides = array<i32>} : memref<3x3x32xf32, #tpu.memory_space<vmem>>, vector<3x1x32xf32>,
    return
  }
  func.func @transform_0(%arg0: i32) -> (i32, i32, i32) {
    %c0_i32 = arith.constant 0 : i32
    %c0_i32_0 = arith.constant 0 : i32
    %c0_i32_1 = arith.constant 0 : i32
    return %arg0, %c0_i32, %c0_i32_0 : i32, i32, i32
  }
  func.func @transform_1(%arg0: i32) -> (i32, i32, i32) {
    %c0_i32 = arith.constant 0 : i32
    %c0_i32_0 = arith.constant 0 : i32
    %c0_i32_1 = arith.constant 0 : i32
    return %arg0, %c0_i32, %c0_i32_0 : i32, i32, i32
  }
  func.func @transform_2(%arg0: i32) -> (i32, i32, i32) {
    %c0_i32 = arith.constant 0 : i32
    %c0_i32_0 = arith.constant 0 : i32
    %c0_i32_1 = arith.constant 0 : i32
    return %arg0, %c0_i32, %c0_i32_0 : i32, i32, i32
  }
}

</mosaic_0001>

<bundles_post_ra>
// kernel: tpu_custom_call.1
= control target key start
LH: loop header
LB: loop body
LE: loop exit
PB: predicated region body
PF: predicated region fallthrough
CT: control target
= control target key end

     0   :  { %7 = vsyncpa [#allocation3], 0  ;;  %s1610_s0 = inlined_call_operand.hbm [shape: f32[5,32,256], index: 0, kind: input, shape index: {}]   ;;  %s1611_s1 = inlined_call_operand.hbm [shape: f32[5,1,256], index: 1, kind: input, shape index: {}]   ;;  %s1612_s2 = inlined_call_operand.hbm [shape: f32[5,3,32], index: 2, kind: output, shape index: {}]  }
   0x1   :  { %9 = vsyncpa [#allocation3 + $0x1], 0 }
   0x2   :  { %10 = vsyncpa [#allocation6], 0 }
   0x3   :  { %12 = vsyncpa [#allocation6 + $0x1], 0 }
   0x4   :  { %13 = vsyncpa [#allocation4], 0 }
   0x5   :  { %15 = vsyncpa [#allocation4 + $0x1], 0  ;;  %s1134_s9 = smov 0   ;;  %s1136_s10 = smov 0  }
   0x6   :  { %s1138_s11 = smov 0   ;;  %s1140_s12 = smov 0  }
   0x7 LB: > { %s1155_s13 = sadd.s32 4294967295, %s1108_s12   ;;  %s880_s14 = sadd.s32 4294967294, %s1108_s12   ;;  %s1108_s12 = sphi %s1140_s12, %s1624_s12   ;;  %s1104_s11 = sphi %s1138_s11, %s1623_s11   ;;  %s1100_s10 = sphi %s1136_s10, %s1622_s10   ;;  %s1096_s9 = sphi %s1134_s9, %s1621_s9  }
   0x8   : > { %s1159_s15 = sadd.s32 1, %s1108_s12   ;;  %s28_s16 = sadd.s32 1, %s1104_s11 }
   0x9   : > { %s25_s17 = ssub.s32 %s1108_s12, %s1159_s15  ;;  %p35_p0 = scmp.ne.s32.totalorder %s1104_s11, %s1100_s10 }
   0xa   : > { %p26_p1 = scmp.eq.s32.totalorder %s25_s17, 0  ;;  %p36_p2 = scmp.eq.s32.totalorder %s1108_s12, 0 }
   0xb   : > { %p41_p3 = scmp.ne.s32.totalorder %s1100_s10, %s1096_s9  ;;  %p42_p4 = scmp.eq.s32.totalorder %s1155_s13, 0 }
   0xc   : > { %s1171_s18 = scalar_select %p26_p1, %s1104_s11, %s28_s16  }
   0xd   : > { %p1173_p5 = por %p36_p2, %p35_p0  ;;  %p1177_p6 = por %p42_p4, %p41_p3 }
   0xe   : > { %p91_p7 = scmp.eq.s32.totalorder %s1155_s13, 1  ;;  %p97_p8 = scmp.eq.s32.totalorder %s880_s14, 1 }
   0xf   : > { %p1613_p11 = scmp.ge.s32.totalorder %s1108_s12, 2 }
  0x10   : > { %p1182_p9 = por %p91_p7, %p35_p0  ;;  %p1186_p10 = por %p97_p8, %p41_p3 }
  0x11   : > { %113 = sbr.rel (%p1613_p11) target bundleno = 90 (0x5a), region = 16 }
  0x12   : > { %s1616_s21 = scalar_select %p1182_p9, 1, 0 }
  0x13   : > { %s1617_s22 = scalar_select %p1186_p10, 1, 0 }
  0x16   : > { %116 = sbr.rel (!%p1173_p5) target bundleno = 56 (0x38), region = 20  ;;  %s117_s23 = sand.u32 (%p1173_p5), 1, %s1104_s11  }
  0x17   : > { %s122_s24 = smul.u32 (%p1173_p5), 3, %s1108_s12  ;;  %s1200_s29 = scalar_lea.sflag (%p1173_p5), [#allocation3], %s117_s23 }
  0x18   : > { %s925_s25 = smul.u32 (%p1173_p5), 192, %s117_s23 }
  0x19   : > { %s123_s26 = ssub.s32 (%p1173_p5), 5, %s122_s24 }
  0x1a   : > { %p124_p12 = scmp.lt.s32.totalorder (%p1173_p5), %s123_s26, 3  ;;  %s121_s30 = scalar_lea.vmem (%p1173_p5), [#allocation2], %s925_s25 }
  0x1c   : > { %s1626_s26 = smov (!%p124_p12, %s123_s26), 3 }
  0x1d   : > { %s1197_s27 = sshll.u32 %s1626_s26, 10 }
  0x1e   : > { %s130_s28 = ssub.s32 3072, %s1197_s27 }
  0x1f   : > { %131 = vsyncadd %s1200_s29, %s130_s28  ;;  %p886_p13 = scmp.ne.s32.totalorder %s1197_s27, 0  ;;  %s923_s3 = smul.u32 3072, %s1108_s12 }
  0x20   : > { %s138_s4 = sshll.u32 %s121_s30, 4  ;;  %s992_s17 = scalar_lea.hbm %s1610_s0, 5120  ;;  %s1210_s4 = int_to_ptr.vmem [resolvable:$true] %s138_s4 }
  0x21   : > { %s1208_s7 = scalar_lea.hbm %s1610_s0, %s923_s3 }
  0x22   : > { %s988_s8 = scalar_lea.hbm %s1208_s7, %s1197_s27  ;;  %p993_p3 = scmp.lt.s32.totalorder %s1208_s7, %s1610_s0 }
  0x23   : > { %p989_p0 = scmp.ne.s32.totalorder %s1208_s7, %s988_s8  ;;  %p994_p4 = scmp.lt.s32.totalorder %s992_s17, %s988_s8 }
  0x25   : > { %p990_p1 = pnand %p989_p0, %p886_p13  ;;  %p995_p7 = por %p994_p4, %p993_p3 }
  0x27   : > { %p991_p2 = pneg %p990_p1 }
  0x29   : > { %p996_p8 = pnand %p995_p7, %p991_p2 }
  0x2b   : > { %999 = shalt.err (!%p996_p8)
}
  0x2c   : > { %s1000_s25 = scalar_lea.vmem %s1210_s4, %s1197_s27  ;;  %s1110_s26 = smov [#allocation2]  }
  0x2d   : > { %p1001_p12 = scmp.ne.s32.totalorder %s1210_s4, %s1000_s25  ;;  %s1004_s28 = sshll.u32 %s1110_s26, 4  ;;  %s1005_s28 = int_to_ptr.vmem [resolvable:$false] %s1004_s28 }
  0x2e   : > { %s1006_s30 = scalar_lea.vmem %s1005_s28, 6144  ;;  %p1007_p11 = scmp.lt.s32.totalorder %s1210_s4, %s1005_s28 }
  0x2f   : > { %p1002_p0 = pnand %p1001_p12, %p886_p13  ;;  %p1008_p10 = scmp.lt.s32.totalorder %s1006_s30, %s1000_s25 }
  0x31   : > { %p1003_p1 = pneg %p1002_p0  ;;  %p1009_p9 = por %p1008_p10, %p1007_p11 }
  0x33   : > { %p1010_p3 = pnand %p1009_p9, %p1003_p1 }
  0x35   : > { %1013 = shalt.err (!%p1010_p3)
}
  0x36   : > { %s1111_s3 = smov 256   ;;  %s1112_s5 = smov 16  }
  0x37   : > { %144 = dma.hbm_to_vmem [thread:$0]  (%p886_p13), %s1208_s7, %s1197_s27, %s1210_s4, %s1200_s29, %s1111_s3, %s1111_s3, %s1112_s5  }
  0x38 PF: > { %147 = sbr.rel (!%p1173_p5) target bundleno = 90 (0x5a), region = 24  ;;  %s148_s6 = sand.u32 (%p1173_p5), 1, %s1104_s11  }
  0x39   : > { %s153_s8 = smul.u32 (%p1173_p5), 3, %s1108_s12  ;;  %s1243_s24 = scalar_lea.sflag (%p1173_p5), [#allocation6], %s148_s6 }
  0x3a   : > { %s926_s14 = smul.u32 (%p1173_p5), 6, %s148_s6 }
  0x3b   : > { %s154_s16 = ssub.s32 (%p1173_p5), 5, %s153_s8 }
  0x3c   : > { %p155_p9 = scmp.lt.s32.totalorder (%p1173_p5), %s154_s16, 3  ;;  %s152_s27 = scalar_lea.vmem (%p1173_p5), [#allocation5], %s926_s14 }
  0x3e   : > { %s1628_s16 = smov (!%p155_p9, %s154_s16), 3 }
  0x3f   : > { %s1240_s17 = sshll.u32 %s1628_s16, 5 }
  0x40   : > { %s160_s23 = ssub.s32 96, %s1240_s17 }
  0x41   : > { %161 = vsyncadd %s1243_s24, %s160_s23  ;;  %p894_p5 = scmp.ne.s32.totalorder %s1240_s17, 0  ;;  %s924_s19 = smul.u32 96, %s1108_s12 }
  0x42   : > { %s167_s29 = sshll.u32 %s152_s27, 4  ;;  %s1018_s3 = scalar_lea.hbm %s1611_s1, 160  ;;  %s1253_s29 = int_to_ptr.vmem [resolvable:$true] %s167_s29 }
  0x43   : > { %s1251_s25 = scalar_lea.hbm %s1611_s1, %s924_s19 }
  0x44   : > { %s1014_s26 = scalar_lea.hbm %s1251_s25, %s1240_s17  ;;  %p1019_p2 = scmp.lt.s32.totalorder %s1251_s25, %s1611_s1 }
  0x45   : > { %p1015_p10 = scmp.ne.s32.totalorder %s1251_s25, %s1014_s26  ;;  %p1020_p4 = scmp.lt.s32.totalorder %s1018_s3, %s1014_s26 }
  0x47   : > { %p1016_p11 = pnand %p1015_p10, %p894_p5  ;;  %p1021_p7 = por %p1020_p4, %p1019_p2 }
  0x49   : > { %p1017_p13 = pneg %p1016_p11 }
  0x4b   : > { %p1022_p8 = pnand %p1021_p7, %p1017_p13 }
  0x4d   : > { %1025 = shalt.err (!%p1022_p8)
}
  0x4e   : > { %s1026_s8 = scalar_lea.vmem %s1253_s29, %s1240_s17  ;;  %s1113_s14 = smov [#allocation5]  }
  0x4f   : > { %p1027_p12 = scmp.ne.s32.totalorder %s1253_s29, %s1026_s8  ;;  %s1030_s16 = sshll.u32 %s1113_s14, 4  ;;  %s1031_s16 = int_to_ptr.vmem [resolvable:$false] %s1030_s16 }
  0x50   : > { %s1032_s23 = scalar_lea.vmem %s1031_s16, 192  ;;  %p1033_p3 = scmp.lt.s32.totalorder %s1253_s29, %s1031_s16 }
  0x51   : > { %p1028_p0 = pnand %p1027_p12, %p894_p5  ;;  %p1034_p9 = scmp.lt.s32.totalorder %s1032_s23, %s1026_s8 }
  0x53   : > { %p1029_p1 = pneg %p1028_p0  ;;  %p1035_p10 = por %p1034_p9, %p1033_p3 }
  0x55   : > { %p1036_p11 = pnand %p1035_p10, %p1029_p1 }
  0x57   : > { %1039 = shalt.err (!%p1036_p11)
}
  0x58   : > { %s1114_s27 = smov 32   ;;  %s1115_s19 = smov 2  }
  0x59   : > { %173 = dma.hbm_to_vmem [thread:$0]  (%p894_p5), %s1251_s25, %s1240_s17, %s1253_s29, %s1243_s24, %s1114_s27, %s1114_s27, %s1115_s19  }
  0x5a PF: > { %p899_p13 = scmp.ge.s32.totalorder %s1108_s12, 1  ;;  %p175_p2 = scmp.lt.s32.totalorder %s1108_s12, 3 }
  0x5c   : > { %p176_p4 = pnand %p899_p13, %p175_p2 }
  0x5d   : > { %s1282_s4 = sand.u32 (!%p176_p4), 1, %s1100_s10  }
  0x5e   : > { %179 = sbr.rel (%p176_p4) target bundleno = 329 (0x149), region = 28  ;;  %s182_s26 = scalar_lea.sflag (!%p176_p4), [#allocation3], %s1282_s4 }
  0x5f   : > { %s927_s7 = smul.u32 (!%p176_p4), 192, %s1282_s4 }
  0x61   : > { %s1286_s28 = scalar_lea.vmem (!%p176_p4), [#allocation2], %s927_s7 }
  0x63   : > { %1083 = dma.done.wait (%p1177_p6), %s182_s26, 3072  }
  0x64   : > { %1085 = vsyncadd (%p1177_p6), %s182_s26, 4294964224  ;;  %s928_s17 = smul.u32 6, %s1282_s4  ;;  %s191_s24 = scalar_lea.sflag [#allocation6], %s1282_s4 }
  0x66   : > { %s194_s29 = scalar_lea.vmem [#allocation5], %s928_s17 }
  0x67   : > { %1087 = dma.done.wait (%p1177_p6), %s191_s24, 96  }
  0x68   : > { %1089 = vsyncadd (%p1177_p6), %s191_s24, 4294967200  ;;  %v268_v0 = vlaneseq  ;;  %v1308_v4 = vld [vmem:[%s1286_s28 + $0x10] sm:$0xff]  ;;  %v1311_v5 = vld [vmem:[%s1286_s28 + $0x18] sm:$0xff]  ;;  %vm298_vm0 = vcmask 1040384   ;;  %vm529_vm1 = vcmask 130112   ;;  %vm536_vm4 = vcmask 195712  }
  0x69   : > { %v262_v6 = vld [vmem:[%s194_s29] sm:$0x3]  ;;  %v353_v7 = vadd.f32 %v1311_v5, %v1308_v4  ;;  %v239_v9 = vld [vmem:[%s1286_s28 + $0x8] sm:$0xff]  ;;  %v1318_v10 = vld [vmem:[%s1286_s28 + $0x50] sm:$0xff]  ;;  %vm543_vm9 = vcmask 261312   ;;  %vm586_vm10 = vcmask 253952  }
  0x6a   : > { %v1299_v1 = vshrl.u32 %v268_v0, 7  ;;  %v238_v8 = vld [vmem:[%s1286_s28] sm:$0xff]  ;;  %v1323_v14 = vld [vmem:[%s1286_s28 + $0x58] sm:$0xff]  ;;  %v1329_v16 = vld [vmem:[%s1286_s28 + $0x48] sm:$0xff]  ;;  %v903_v41 = vadd.f32 -1.0, %v262_v6  ;;  %v519_v61 = vand.u32 127, %v268_v0 }
  0x6b   : > { %v350_v13 = vadd.f32 %v239_v9, %v238_v8  ;;  %v1326_v15 = vld [vmem:[%s1286_s28 + $0x40] sm:$0xff]  ;;  %354 = vadd.xlane.f32.xlu0 %v353_v7  ;;  %v365_v17 = vadd.f32 %v1323_v14, %v1318_v10  ;;  %v1342_v25 = vld [vmem:[%s1286_s28 + $0x88] sm:$0xff]  ;;  %v256_v37 = vld [vmem:[%s1286_s28 + $0x90] sm:$0xff]  ;;  %s929_s20 = smul.u32 12, %s1282_s4  ;;  %s765_s30 = scalar_lea.sflag [#allocation4], %s1282_s4 }
  0x6c   : > { %v1302_v2 = vsub.s32 0, %v1299_v1  ;;  %v1305_v3 = vsub.s32 1, %v1299_v1  ;;  %v263_v18 = vld [vmem:[%s194_s29 + $0x2] sm:$0x3]  ;;  %v362_v19 = vadd.f32 %v1329_v16, %v1326_v15  ;;  %v264_v23 = vld [vmem:[%s194_s29 + $0x4] sm:$0x3] }
  0x6d   : > { %351 = vadd.xlane.f32.xlu1 %v350_v13  ;;  %v1339_v24 = vld [vmem:[%s1286_s28 + $0x80] sm:$0xff]  ;;  %v257_v38 = vld [vmem:[%s1286_s28 + $0x98] sm:$0xff]  ;;  %v243_v40 = vld [vmem:[%s1286_s28 + $0x28] sm:$0xff]  ;;  %v904_v51 = vadd.f32 -1.0, %v263_v18  ;;  %v905_v59 = vadd.f32 -1.0, %v264_v23  ;;  %s1473_s25 = scalar_lea.vmem [#allocation7], %s929_s20 }
  0x6e   : > { %v271_v11 = vrot.slane %v262_v6, %v1302_v2  ;;  %v275_v12 = vrot.slane %v262_v6, %v1305_v3  ;;  %v279_v22 = vrot.slane %v263_v18, %v1302_v2  ;;  %v283_v26 = vrot.slane %v263_v18, %v1305_v3  ;;  %v242_v39 = vld [vmem:[%s1286_s28 + $0x20] sm:$0xff]  ;;  %v251_v45 = vld [vmem:[%s1286_s28 + $0x68] sm:$0xff]  ;;  %v244_v53 = vld [vmem:[%s1286_s28 + $0x30] sm:$0xff]  ;;  %p1618_p6 = scmp.ne.s32.totalorder %s1616_s21, 0 }
  0x6f   : > { %366 = vadd.xlane.f32.xlu0 %v365_v17  ;;  %v287_v28 = vrot.slane %v264_v23, %v1302_v2  ;;  %v291_v29 = vrot.slane %v264_v23, %v1305_v3  ;;  %v374_v30 = vadd.f32 %v1342_v25, %v1339_v24  ;;  %v377_v42 = vadd.f32 %v257_v38, %v256_v37  ;;  %v250_v44 = vld [vmem:[%s1286_s28 + $0x60] sm:$0xff]  ;;  %v259_v47 = vld [vmem:[%s1286_s28 + $0xa8] sm:$0xff]  ;;  %v245_v54 = vld [vmem:[%s1286_s28 + $0x38] sm:$0xff]  ;;  %s772_s3 = smul.u32 (%p1618_p6), 3, %s1155_s13 }
  0x70   : > { %v299_v20 = vsel %vm298_vm0, %v271_v11, 0.0  ;;  %v300_v21 = vsel %vm298_vm0, %v275_v12, 0.0  ;;  %v304_v31 = vsel %vm298_vm0, %v279_v22, 0.0  ;;  %v305_v32 = vsel %vm298_vm0, %v283_v26, 0.0  ;;  %v258_v46 = vld [vmem:[%s1286_s28 + $0xa0] sm:$0xff]  ;;  %v252_v55 = vld [vmem:[%s1286_s28 + $0x70] sm:$0xff] }
  0x71   : > { %v301_v27 = vadd.f32 %v300_v21, %v299_v20  ;;  %363 = vadd.xlane.f32.xlu1 %v362_v19  ;;  %v309_v33 = vsel %vm298_vm0, %v287_v28, 0.0  ;;  %v310_v34 = vsel %vm298_vm0, %v291_v29, 0.0  ;;  %v306_v35 = vadd.f32 %v305_v32, %v304_v31  ;;  %v253_v56 = vld [vmem:[%s1286_s28 + $0x78] sm:$0xff]  ;;  %v260_v7 = vld [vmem:[%s1286_s28 + $0xb0] sm:$0xff]  ;;  %s773_s5 = ssub.s32 (%p1618_p6), 5, %s772_s3 }
  0x72   : > { %v311_v36 = vadd.f32 %v310_v34, %v309_v33  ;;  %v356_v43 = vadd.f32 %v243_v40, %v242_v39  ;;  %v1362_v48 = vrot.slane %v903_v41, %v1302_v2  ;;  %v1365_v49 = vrot.slane %v903_v41, %v1305_v3  ;;  %v261_v11 = vld [vmem:[%s1286_s28 + $0xb8] sm:$0xff]  ;;  %p774_p5 = scmp.lt.s32.totalorder (%p1618_p6), %s773_s5, 3 }
  0x73   : > { %302 = vadd.xlane.f32.xlu0 %v301_v27  ;;  %v368_v50 = vadd.f32 %v251_v45, %v250_v44  ;;  %v380_v52 = vadd.f32 %v259_v47, %v258_v46  ;;  %v359_v60 = vadd.f32 %v245_v54, %v244_v53  ;;  %v427_v62 = vrot.slane %v904_v51, %v1302_v2 }
  0x74   : > { %v446_v57 = vadd.f32 %v1362_v48, %v238_v8  ;;  %v447_v58 = vadd.f32 %v1365_v49, %v239_v9  ;;  %v431_v63 = vrot.slane %v904_v51, %v1305_v3  ;;  %v371_v6 = vadd.f32 %v253_v56, %v252_v55 }
  0x75   : > { %375 = vadd.xlane.f32.xlu1 %v374_v30  ;;  %v448_v12 = vadd.f32 %v1362_v48, %v1308_v4  ;;  %v449_v8 = vadd.f32 %v1365_v49, %v1311_v5  ;;  %v435_v9 = vrot.slane %v905_v59, %v1302_v2  ;;  %v439_v13 = vrot.slane %v905_v59, %v1305_v3 }
  0x76   : > { %v383_v0 = vadd.f32 %v261_v11, %v260_v7  ;;  %v470_v17 = vmax.f32 %v446_v57, %v447_v58  ;;  %v454_v18 = vadd.f32 %v427_v62, %v1326_v15  ;;  %v455_v19 = vadd.f32 %v431_v63, %v1329_v16 }
  0x77   : > { %307 = vadd.xlane.f32.xlu0 %v306_v35  ;;  %v1387_v20 = vsub.s32 %v519_v61, %v1299_v1  ;;  %v524_v21 = vadd.s32 4294967288, %v519_v61  ;;  %v473_v5 = vmax.f32 %v448_v12, %v449_v8  ;;  %v456_v22 = vadd.f32 %v427_v62, %v1318_v10 }
  0x78   : > { %v457_v3 = vadd.f32 %v431_v63, %v1323_v14  ;;  %v482_v23 = vmax.f32 %v454_v18, %v455_v19  ;;  %v462_v26 = vadd.f32 %v435_v9, %v1339_v24  ;;  %v463_v15 = vadd.f32 %v439_v13, %v1342_v25 }
  0x79   : > { %312 = vadd.xlane.f32.xlu1 %v311_v36  ;;  %v1390_v4 = vsub.s32 %v524_v21, %v1299_v1  ;;  %v464_v27 = vadd.f32 %v435_v9, %v256_v37  ;;  %v465_v28 = vadd.f32 %v439_v13, %v257_v38  ;;  %v450_v30 = vadd.f32 %v1362_v48, %v242_v39 }
  0x7a   : > { %v485_v16 = vmax.f32 %v456_v22, %v457_v3  ;;  %v494_v29 = vmax.f32 %v462_v26, %v463_v15  ;;  %v451_v31 = vadd.f32 %v1365_v49, %v243_v40  ;;  %v458_v32 = vadd.f32 %v427_v62, %v250_v44 }
  0x7b   : > { %378 = vadd.xlane.f32.xlu0 %v377_v42  ;;  %v497_v10 = vmax.f32 %v464_v27, %v465_v28  ;;  %v459_v14 = vadd.f32 %v431_v63, %v251_v45  ;;  %v531_v33 = vadd.s32 4294967280, %v519_v61  ;;  %v466_v24 = vadd.f32 %v435_v9, %v258_v46 }
  0x7c   : > { %v476_v34 = vmax.f32 %v450_v30, %v451_v31  ;;  %v467_v35 = vadd.f32 %v439_v13, %v259_v47  ;;  %v452_v37 = vadd.f32 %v1362_v48, %v244_v53  ;;  %v453_v38 = vadd.f32 %v1365_v49, %v245_v54 }
  0x7d   : > { %357 = vadd.xlane.f32.xlu1 %v356_v43  ;;  %v1399_v25 = vsub.s32 %v531_v33, %v1299_v1  ;;  %v488_v36 = vmax.f32 %v458_v32, %v459_v14  ;;  %v460_v40 = vadd.f32 %v427_v62, %v252_v55  ;;  %v461_v41 = vadd.f32 %v431_v63, %v253_v56 }
  0x7e   : > { %v500_v39 = vmax.f32 %v466_v24, %v467_v35  ;;  %v538_v42 = vadd.s32 4294967272, %v519_v61  ;;  %v479_v43 = vmax.f32 %v452_v37, %v453_v38  ;;  %v468_v44 = vadd.f32 %v435_v9, %v260_v7 }
  0x7f   : > { %369 = vadd.xlane.f32.xlu0 %v368_v50  ;;  %v469_v45 = vadd.f32 %v439_v13, %v261_v11  ;;  %v491_v46 = vmax.f32 %v460_v40, %v461_v41 }
  0x80   : > { %v1404_v47 = vsub.s32 %v538_v42, %v1299_v1 }
  0x81   : > { %381 = vadd.xlane.f32.xlu1 %v380_v52  ;;  %v503_v50 = vmax.f32 %v468_v44, %v469_v45 }
  0x83   : > { %360 = vadd.xlane.f32.xlu0 %v359_v60 }
  0x85   : > { %372 = vadd.xlane.f32.xlu1 %v371_v6 }
  0x87   : > { %384 = vadd.xlane.f32.xlu0 %v383_v0 }
  0x89   : > { %471 = vmax.xlane.f32.xlu1 %v470_v17 }
  0x8b   : > { %474 = vmax.xlane.f32.xlu0 %v473_v5 }
  0x8d   : > { %483 = vmax.xlane.f32.xlu1 %v482_v23 }
  0x8f   : > { %486 = vmax.xlane.f32.xlu0 %v485_v16 }
  0x91   : > { %495 = vmax.xlane.f32.xlu1 %v494_v29 }
  0x93   : > { %498 = vmax.xlane.f32.xlu0 %v497_v10 }
  0x95   : > { %477 = vmax.xlane.f32.xlu1 %v476_v34 }
  0x97   : > { %489 = vmax.xlane.f32.xlu0 %v488_v36 }
  0x99   : > { %501 = vmax.xlane.f32.xlu1 %v500_v39 }
  0x9b   : > { %480 = vmax.xlane.f32.xlu0 %v479_v43 }
  0x9d   : > { %492 = vmax.xlane.f32.xlu1 %v491_v46 }
  0x9f   : > { %504 = vmax.xlane.f32.xlu0 %v503_v50 }
  0xf4   : > { %v355_v48 = vpop.xlane.xlu0 %354 }
  0xf6   : > { %v352_v49 = vpop.xlane.xlu1 %351 }
  0xf8   : > { %v1406_v51 = vpop.xlane.xlu0 %366 }
  0xfa   : > { %v1408_v52 = vpop.xlane.xlu1 %363 }
  0xfc   : > { %v303_v53 = vpop.xlane.xlu0 %302 }
  0xfd   : > { %v314_v54 = vmax.f32 %v303_v53, 1.0 }
  0xfe   : > { %v1410_v55 = vpop.xlane.xlu1 %375 }
  0xff   : > { %976 = vrsqrt.f32 %v314_v54  ;;  %vm325_vm2 = vcmp.eq.f32.partialorder %v314_v54, inf  ;;  %vm327_vm3 = vcmp.eq.f32.partialorder %v314_v54, 0.0  ;;  %v328_v8 = vand.u32 2147483648, %v314_v54 }
 0x100   : > { %v308_v56 = vpop.xlane.xlu0 %307  ;;  %978 = vrcp.f32 %v314_v54 }
 0x101   : > { %v315_v57 = vmax.f32 %v308_v56, 1.0 }
 0x102   : > { %v313_v1 = vpop.xlane.xlu1 %312 }
 0x103   : > { %v316_v58 = vmax.f32 %v313_v1, 1.0  ;;  %980 = vrsqrt.f32 %v315_v57  ;;  %vm332_vm5 = vcmp.eq.f32.partialorder %v315_v57, inf  ;;  %vm334_vm6 = vcmp.eq.f32.partialorder %v315_v57, 0.0 }
 0x104   : > { %v379_v59 = vpop.xlane.xlu0 %378  ;;  %v335_v0 = vand.u32 2147483648, %v315_v57 }
 0x105   : > { %982 = vrsqrt.f32 %v316_v58  ;;  %vm339_vm7 = vcmp.eq.f32.partialorder %v316_v58, inf  ;;  %vm341_vm8 = vcmp.eq.f32.partialorder %v316_v58, 0.0  ;;  %v342_v23 = vand.u32 2147483648, %v316_v58 }
 0x106   : > { %984 = vrcp.f32 %v316_v58  ;;  %v358_v60 = vpop.xlane.xlu1 %357 }
 0x107   : > { %986 = vrcp.f32 %v315_v57 }
 0x108   : > { %v1412_v61 = vpop.xlane.xlu0 %369 }
 0x10a   : > { %v1414_v62 = vpop.xlane.xlu1 %381 }
 0x10c   : > { %v977_v63 = vpop.eup %976  ;;  %v361_v6 = vpop.xlane.xlu0 %360 }
 0x10d   : > { %v979_v7 = vpop.eup %978  ;;  %v324_v11 = vmul.f32 %v977_v63, %v314_v54 }
 0x10e   : > { %v1416_v12 = vpop.xlane.xlu1 %372  ;;  %v389_v9 = vrot.slane %v979_v7, %v1302_v2 }
 0x10f   : > { %v326_v13 = vsel %vm325_vm2, %v314_v54, %v324_v11 }
 0x110   : > { %v981_v17 = vpop.eup %980  ;;  %v329_v18 = vsel %vm327_vm3, %v328_v8, %v326_v13  ;;  %v398_v19 = vmul.f32 %v389_v9, %v352_v49  ;;  %v399_v21 = vmul.f32 %v389_v9, %v355_v48  ;;  %v400_v5 = vmul.f32 %v389_v9, %v358_v60  ;;  %v1419_v22 = vpop.xlane.xlu0 %384 }
 0x111   : > { %v900_v26 = vadd.f32 -14.0, %v329_v18  ;;  %v331_v15 = vmul.f32 %v981_v17, %v315_v57  ;;  %v1421_v16 = vmul.f32 %v389_v9, %v361_v6 }
 0x112   : > { %v983_v3 = vpop.eup %982  ;;  %v1423_v27 = vpop.xlane.xlu1 %471  ;;  %v523_v30 = vrot.slane %v398_v19, %v1387_v20  ;;  %v528_v31 = vrot.slane %v399_v21, %v1390_v4  ;;  %v535_v10 = vrot.slane %v400_v5, %v1399_v25 }
 0x113   : > { %v985_v28 = vpop.eup %984  ;;  %v338_v29 = vmul.f32 %v983_v3, %v316_v58  ;;  %v347_v33 = vmul.f32 0.1, %v900_v26  ;;  %v333_v34 = vsel %vm332_vm5, %v315_v57, %v331_v15  ;;  %v542_v24 = vrot.slane %v1421_v16, %v1404_v47 }
 0x114   : > { %v987_v32 = vpop.eup %986  ;;  %v1429_v14 = vrot.slane %v985_v28, %v1302_v2  ;;  %v530_v36 = vsel %vm529_vm1, %v528_v31, %v523_v30  ;;  %v336_v37 = vsel %vm334_vm6, %v335_v0, %v333_v34  ;;  %v1438_v39 = vpop.xlane.xlu0 %474 }
 0x115   : > { %v340_v35 = vsel %vm339_vm7, %v316_v58, %v338_v29  ;;  %v393_v38 = vrot.slane %v987_v32, %v1302_v2  ;;  %v593_v43 = vrot.slane %v347_v33, %v1302_v2  ;;  %v537_v46 = vsel %vm536_vm4, %v535_v10, %v530_v36 }
 0x116   : > { %v343_v40 = vsel %vm341_vm8, %v342_v23, %v340_v35  ;;  %v406_v41 = vmul.f32 %v1429_v14, %v1410_v55  ;;  %v407_v42 = vmul.f32 %v1429_v14, %v379_v59  ;;  %v1446_v44 = vpop.xlane.xlu1 %483  ;;  %v901_v50 = vadd.f32 -14.0, %v336_v37 }
 0x117   : > { %v902_v45 = vadd.f32 -14.0, %v343_v40  ;;  %v403_v48 = vmul.f32 %v393_v38, %v1406_v51  ;;  %v602_v54 = vmul.f32 %v593_v43, %v398_v19  ;;  %v603_v56 = vmul.f32 %v593_v43, %v399_v21 }
 0x118   : > { %v567_v49 = vrot.slane %v406_v41, %v1387_v20  ;;  %v571_v53 = vrot.slane %v407_v42, %v1390_v4  ;;  %v604_v57 = vmul.f32 %v593_v43, %v400_v5  ;;  %v348_v1 = vmul.f32 0.1, %v901_v50  ;;  %v1453_v59 = vpop.xlane.xlu0 %486 }
 0x119   : > { %v349_v55 = vmul.f32 0.1, %v902_v45  ;;  %v552_v58 = vrot.slane %v403_v48, %v1390_v4  ;;  %v629_v63 = vrot.slane %v602_v54, %v1387_v20  ;;  %v633_v51 = vrot.slane %v603_v56, %v1390_v4 }
 0x11a   : > { %v572_v60 = vsel %vm529_vm1, %v571_v53, %v567_v49  ;;  %v402_v6 = vmul.f32 %v393_v38, %v1408_v52  ;;  %v1459_v7 = vpop.xlane.xlu1 %495  ;;  %v638_v8 = vrot.slane %v604_v57, %v1399_v25  ;;  %v597_v9 = vrot.slane %v348_v1, %v1302_v2 }
 0x11b   : > { %v601_v11 = vrot.slane %v349_v55, %v1302_v2  ;;  %v404_v13 = vmul.f32 %v393_v38, %v1412_v61  ;;  %v634_v0 = vsel %vm529_vm1, %v633_v51, %v629_v63  ;;  %v408_v18 = vmul.f32 %v1429_v14, %v1414_v62 }
 0x11c   : > { %v548_v17 = vrot.slane %v402_v6, %v1387_v20  ;;  %v544_v19 = vsel %vm543_vm9, %v542_v24, %v537_v46  ;;  %v639_v5 = vsel %vm536_vm4, %v638_v8, %v634_v0  ;;  %v607_v3 = vmul.f32 %v597_v9, %v403_v48  ;;  %v499_v2 = vpop.xlane.xlu0 %498 }
 0x11d   : > { %v610_v52 = vmul.f32 %v601_v11, %v406_v41  ;;  %v611_v21 = vmul.f32 %v601_v11, %v407_v42  ;;  %587 = vst.msk [vmem:[%s1473_s25] sm:$0x1] %vm586_vm10, %v544_v19  ;;  %v557_v23 = vrot.slane %v404_v13, %v1399_v25  ;;  %v606_v26 = vmul.f32 %v597_v9, %v402_v6 }
 0x11e   : > { %v553_v61 = vsel %vm529_vm1, %v552_v58, %v548_v17  ;;  %v608_v62 = vmul.f32 %v597_v9, %v404_v13  ;;  %v478_v15 = vpop.xlane.xlu1 %477  ;;  %v652_v30 = vrot.slane %v607_v3, %v1390_v4  ;;  %v576_v31 = vrot.slane %v408_v18, %v1399_v25 }
 0x11f   : > { %v667_v28 = vrot.slane %v610_v52, %v1387_v20  ;;  %v671_v29 = vrot.slane %v611_v21, %v1390_v4  ;;  %v558_v10 = vsel %vm536_vm4, %v557_v23, %v553_v61  ;;  %v648_v32 = vrot.slane %v606_v26, %v1387_v20 }
 0x120   : > { %v657_v33 = vrot.slane %v608_v62, %v1399_v25  ;;  %v612_v34 = vmul.f32 %v601_v11, %v408_v18  ;;  %v577_v35 = vsel %vm536_vm4, %v576_v31, %v572_v60  ;;  %v605_v36 = vmul.f32 %v593_v43, %v1421_v16  ;;  %v490_v40 = vpop.xlane.xlu0 %489 }
 0x121   : > { %v672_v24 = vsel %vm529_vm1, %v671_v29, %v667_v28  ;;  %v405_v37 = vmul.f32 %v393_v38, %v1416_v12  ;;  %v653_v41 = vsel %vm529_vm1, %v652_v30, %v648_v32  ;;  %v409_v45 = vmul.f32 %v1429_v14, %v1419_v22 }
 0x122   : > { %v676_v42 = vrot.slane %v612_v34, %v1399_v25  ;;  %v704_v46 = vrot.slane %v1423_v27, %v1387_v20  ;;  %v502_v50 = vpop.xlane.xlu1 %501  ;;  %v658_v48 = vsel %vm536_vm4, %v657_v33, %v653_v41  ;;  %v643_v16 = vrot.slane %v605_v36, %v1404_v47 }
 0x123   : > { %v562_v12 = vrot.slane %v405_v37, %v1404_v47  ;;  %v609_v38 = vmul.f32 %v597_v9, %v405_v37  ;;  %v581_v49 = vrot.slane %v409_v45, %v1404_v47  ;;  %v613_v53 = vmul.f32 %v601_v11, %v409_v45 }
 0x124   : > { %v677_v43 = vsel %vm536_vm4, %v676_v42, %v672_v24  ;;  %v708_v22 = vrot.slane %v1438_v39, %v1390_v4  ;;  %v644_v27 = vsel %vm543_vm9, %v643_v16, %v639_v5  ;;  %v723_v56 = vrot.slane %v1446_v44, %v1387_v20  ;;  %v481_v55 = vpop.xlane.xlu0 %480 }
 0x125   : > { %v563_v14 = vsel %vm543_vm9, %v562_v12, %v558_v10  ;;  %v662_v54 = vrot.slane %v609_v38, %v1404_v47  ;;  %686 = vst.msk [vmem:[%s1473_s25 + $0x1] sm:$0x1] %vm586_vm10, %v644_v27  ;;  %v582_v57 = vsel %vm543_vm9, %v581_v49, %v577_v35  ;;  %v681_v39 = vrot.slane %v613_v53, %v1404_v47 }
 0x126   : > { %588 = vst.msk [vmem:[%s1473_s25 + $0x4] sm:$0x1] %vm586_vm10, %v563_v14  ;;  %v709_v1 = vsel %vm529_vm1, %v708_v22, %v704_v46  ;;  %v727_v58 = vrot.slane %v1453_v59, %v1390_v4  ;;  %v493_v60 = vpop.xlane.xlu1 %492  ;;  %589 = vst.msk [vmem:[%s1473_s25 + $0x8] sm:$0x1] %vm586_vm10, %v582_v57  ;;  %v742_v44 = vrot.slane %v1459_v7, %v1387_v20 }
 0x127   : > { %v663_v63 = vsel %vm543_vm9, %v662_v54, %v658_v48  ;;  %v746_v51 = vrot.slane %v499_v2, %v1390_v4  ;;  %v713_v6 = vrot.slane %v478_v15, %v1399_v25  ;;  %v682_v11 = vsel %vm543_vm9, %v681_v39, %v677_v43 }
 0x128   : > { %687 = vst.msk [vmem:[%s1473_s25 + $0x5] sm:$0x1] %vm586_vm10, %v663_v63  ;;  %v728_v59 = vsel %vm529_vm1, %v727_v58, %v723_v56  ;;  %v732_v8 = vrot.slane %v490_v40, %v1399_v25  ;;  %v751_v9 = vrot.slane %v502_v50, %v1399_v25  ;;  %688 = vst.msk [vmem:[%s1473_s25 + $0x9] sm:$0x1] %vm586_vm10, %v682_v11  ;;  %v505_v0 = vpop.xlane.xlu0 %504 }
 0x129   : > { %v747_v20 = vsel %vm529_vm1, %v746_v51, %v742_v44  ;;  %v714_v4 = vsel %vm536_vm4, %v713_v6, %v709_v1  ;;  %v718_v7 = vrot.slane %v481_v55, %v1404_v47  ;;  %v737_v13 = vrot.slane %v493_v60, %v1404_v47  ;;  %771 = sbr.rel (!%p1618_p6) target bundleno = 329 (0x149), region = 40 }
 0x12a   : > { %v733_v17 = vsel %vm536_vm4, %v732_v8, %v728_v59  ;;  %v752_v18 = vsel %vm536_vm4, %v751_v9, %v747_v20  ;;  %v756_v19 = vrot.slane %v505_v0, %v1404_v47 }
 0x12b   : > { %v719_v25 = vsel %vm543_vm9, %v718_v7, %v714_v4  ;;  %v738_v52 = vsel %vm543_vm9, %v737_v13, %v733_v17 }
 0x12c   : > { %761 = vst.msk [vmem:[%s1473_s25 + $0x2] sm:$0x1] %vm586_vm10, %v719_v25  ;;  %762 = vst.msk [vmem:[%s1473_s25 + $0x6] sm:$0x1] %vm586_vm10, %v738_v52  ;;  %v757_v21 = vsel %vm543_vm9, %v756_v19, %v752_v18 }
 0x12d   : > { %763 = vst.msk [vmem:[%s1473_s25 + $0xa] sm:$0x1] %vm586_vm10, %v757_v21 }
 0x12e   : > { %s1630_s5 = smov (!%p774_p5, %s773_s5), 3 }
 0x12f   : > { %s1552_s6 = sshll.u32 %s1630_s5, 6 }
 0x130   : > { %s778_s8 = ssub.s32 192, %s1552_s6 }
 0x131   : > { %779 = vsyncadd %s765_s30, %s778_s8  ;;  %p907_p7 = scmp.ne.s32.totalorder %s1552_s6, 0  ;;  %s922_s21 = smul.u32 192, %s1155_s13 }
 0x132   : > { %s784_s14 = sshll.u32 %s1473_s25, 4  ;;  %s1116_s7 = smov [#allocation7]   ;;  %s1565_s14 = int_to_ptr.vmem [resolvable:$true] %s784_s14 }
 0x133   : > { %s1563_s27 = scalar_lea.hbm %s1612_s2, %s922_s21  ;;  %s1040_s19 = scalar_lea.vmem %s1565_s14, %s1552_s6 }
 0x134   : > { %p1041_p8 = scmp.ne.s32.totalorder %s1565_s14, %s1040_s19  ;;  %s1044_s26 = sshll.u32 %s1116_s7, 4  ;;  %s1045_s26 = int_to_ptr.vmem [resolvable:$false] %s1044_s26 }
 0x135   : > { %s1046_s13 = scalar_lea.vmem %s1045_s26, 384  ;;  %p1047_p1 = scmp.lt.s32.totalorder %s1565_s14, %s1045_s26 }
 0x136   : > { %p1042_p12 = pnand %p1041_p8, %p907_p7  ;;  %p1048_p3 = scmp.lt.s32.totalorder %s1046_s13, %s1040_s19 }
 0x138   : > { %p1043_p0 = pneg %p1042_p12  ;;  %p1049_p9 = por %p1048_p3, %p1047_p1 }
 0x13a   : > { %p1050_p10 = pnand %p1049_p9, %p1043_p0 }
 0x13c   : > { %1053 = shalt.err (!%p1050_p10)
}
 0x13d   : > { %s1054_s28 = scalar_lea.hbm %s1563_s27, %s1552_s6  ;;  %s1058_s29 = scalar_lea.hbm %s1612_s2, 320 }
 0x13e   : > { %p1055_p11 = scmp.ne.s32.totalorder %s1563_s27, %s1054_s28  ;;  %p1059_p4 = scmp.lt.s32.totalorder %s1563_s27, %s1612_s2 }
 0x13f   : > { %p1060_p6 = scmp.lt.s32.totalorder %s1058_s29, %s1054_s28 }
 0x140   : > { %p1056_p13 = pnand %p1055_p11, %p907_p7 }
 0x141   : > { %p1061_p5 = por %p1060_p6, %p1059_p4 }
 0x142   : > { %p1057_p2 = pneg %p1056_p13 }
 0x144   : > { %p1062_p8 = pnand %p1061_p5, %p1057_p2 }
 0x146   : > { %1065 = shalt.err (!%p1062_p8)
}
 0x147   : > { %s1117_s3 = smov 64   ;;  %s1118_s5 = smov 4  }
 0x148   : > { %790 = dma.vmem_to_hbm [thread:$0]  (%p907_p7), %s1565_s14, %s1552_s6, %s1563_s27, %s765_s30, %s1117_s3, %s1117_s3, %s1118_s5  }
 0x149 PF: > { %s799_s8 = sand.u32 1, %s1096_s9   ;;  %p1619_p12 = scmp.ne.s32.totalorder %s1617_s22, 0 }
 0x14a   : > { %p1620_p0 = scmp.ge.s32.totalorder %s1108_s12, 2  ;;  %s800_s21 = scalar_lea.sflag [#allocation4], %s799_s8 }
 0x14c   : > { %p934_p1 = pnand %p1620_p0, %p1619_p12 }
 0x14e   : > { %p935_p3 = pneg %p934_p1 }
 0x150   : > { %1091 = dma.done.wait (%p935_p3), %s800_s21, 192  }
 0x151   : > { %1093 = vsyncadd (%p935_p3), %s800_s21, 4294967104  ;;  %p18_p9 = scmp.ge.s32.totalorder %s1159_s15, 4   ;;  %s1621_s9 = smov %s1100_s10 }
 0x152   : > { %s1622_s10 = smov %s1104_s11  ;;  %s1623_s11 = smov %s1171_s18 }
 0x153   : > { %s1624_s12 = smov %s1159_s15  ;;  %20 = sbr.rel (!%p18_p9) target bundleno = 7 (0x7), region = 86 }
 0x158   :  { %805 = vsyncpa [#allocation3], 1 }
 0x159   :  { %807 = vsyncpa [#allocation3 + $0x1], 1 }
 0x15a   :  { %808 = vsyncpa [#allocation6], 1 }
 0x15b   :  { %810 = vsyncpa [#allocation6 + $0x1], 1 }
 0x15c   :  { %811 = vsyncpa [#allocation4], 1 }
 0x15d   :  { %813 = vsyncpa [#allocation4 + $0x1], 1 }

</bundles_post_ra>
